<compile_context>
chip_gen: v5e
topology: v5e:2x2
jax: 0.10.0
libtpu: 0.0.40
codegen_flags: <defaults>
</compile_context>

<pallas_src>
import jax
import jax.numpy as jnp
from jax.experimental import pallas as pl
from jax.experimental.pallas import tpu as pltpu


def _round_up(a, b):
    return ((a + b - 1) // b) * b


def _conv_relu_kernel(p_ref, w_ref, b_ref, o_ref, acc_ref):
    """One (tm, tk) x (tk, C_out_pad) partial matmul; bias + ReLU on last K step."""
    k = pl.program_id(1)

    @pl.when(k == 0)
    def _init():
        acc_ref[...] = jnp.zeros_like(acc_ref)

    acc_ref[...] += jnp.dot(p_ref[...], w_ref[...],
                            preferred_element_type=jnp.float32)

    @pl.when(k == pl.num_programs(1) - 1)
    def _finalize():
        out = jnp.maximum(acc_ref[...] + b_ref[...], 0.0)
        o_ref[...] = out.astype(o_ref.dtype)


def basic_conv2d(x, weight, bias, *, stride=1, padding=0,
                 compute_dtype=jnp.bfloat16):
    """Conv2d(stride, padding) + ReLU.  x: (N, C_in, H, W) -> (N, C_out, H', W')."""
    N, C_in, H, W = x.shape
    C_out, C_in_w, KH, KW = weight.shape
    assert C_in == C_in_w

    H_out = (H + 2 * padding - KH) // stride + 1
    W_out = (W + 2 * padding - KW) // stride + 1
    M = N * H_out * W_out
    K = C_in * KH * KW

    # ---- im2col in NHWC (plain-JAX glue; (kh, kw, c) feature ordering) -----
    x_nhwc = jnp.transpose(x, (0, 2, 3, 1))
    xp = jnp.pad(x_nhwc, ((0, 0), (padding, padding), (padding, padding), (0, 0)))
    cols = []
    for kh in range(KH):
        for kw in range(KW):
            cols.append(xp[:, kh:kh + stride * H_out:stride,
                           kw:kw + stride * W_out:stride, :])
    patches = jnp.concatenate(cols, axis=-1).reshape(M, K)
    # weight (C_out, C_in, KH, KW) -> (KH, KW, C_in, C_out) -> (K, C_out)
    w2d = jnp.transpose(weight, (2, 3, 1, 0)).reshape(K, C_out)

    # ---- TPU-friendly padding & tiling --------------------------------------
    LANE = 128
    C_out_pad = _round_up(C_out, LANE)          # lane-dense output / MXU columns

    K_128 = _round_up(K, LANE)                  # lane-dense contraction
    if K_128 <= 512:
        tk, K_pad = K_128, K_128
    else:
        tk = 512
        K_pad = _round_up(K, tk)

    tm = 512 if M > 512 else 256                # big row tile; >=2 M-steps when small
    M_pad = _round_up(M, tm)

    patches = jnp.pad(patches, ((0, M_pad - M), (0, K_pad - K)))
    w2d = jnp.pad(w2d, ((0, K_pad - K), (0, C_out_pad - C_out)))
    b2d = jnp.pad(bias.astype(jnp.float32).reshape(1, C_out),
                  ((0, 0), (0, C_out_pad - C_out)))

    patches = patches.astype(compute_dtype)
    w2d = w2d.astype(compute_dtype)

    grid = (M_pad // tm, K_pad // tk)

    bytes_accessed = (patches.size * patches.dtype.itemsize
                      + w2d.size * w2d.dtype.itemsize * grid[0]
                      + b2d.size * 4
                      + M_pad * C_out_pad * x.dtype.itemsize)
    cost = pl.CostEstimate(flops=2 * M_pad * K_pad * C_out_pad,
                           transcendentals=0,
                           bytes_accessed=int(bytes_accessed))

    out = pl.pallas_call(
        _conv_relu_kernel,
        out_shape=jax.ShapeDtypeStruct((M_pad, C_out_pad), x.dtype),
        grid=grid,
        in_specs=[
            pl.BlockSpec((tm, tk), lambda i, k: (i, k)),
            pl.BlockSpec((tk, C_out_pad), lambda i, k: (k, 0)),
            pl.BlockSpec((1, C_out_pad), lambda i, k: (0, 0)),
        ],
        out_specs=pl.BlockSpec((tm, C_out_pad), lambda i, k: (i, 0)),
        scratch_shapes=[pltpu.VMEM((tm, C_out_pad), jnp.float32)],
        compiler_params=pltpu.CompilerParams(
            dimension_semantics=("parallel", "arbitrary")),
        cost_estimate=cost,
    )(patches, w2d, b2d)

    out = out[:M, :C_out]                       # drop row/channel padding
    return out.reshape(N, H_out, W_out, C_out).transpose(0, 3, 1, 2)


if __name__ == "__main__":
    # BasicConv2d(in_channels=4, out_channels=8, kernel_size=3, padding=1)
    N, C_in, H, W = 2, 4, 16, 16
    C_out, KH, KW = 8, 3, 3

    key = jax.random.PRNGKey(0)
    kx, kw_, kb = jax.random.split(key, 3)
    x = jax.random.normal(kx, (N, C_in, H, W), dtype=jnp.float32)
    fan_in = C_in * KH * KW
    bound = 1.0 / (fan_in ** 0.5)
    weight = jax.random.uniform(kw_, (C_out, C_in, KH, KW),
                                minval=-bound, maxval=bound, dtype=jnp.float32)
    bias = jax.random.uniform(kb, (C_out,),
                              minval=-bound, maxval=bound, dtype=jnp.float32)

    # Reference: XLA conv + bias + relu (f32).
    ref = jax.lax.conv_general_dilated(
        x, weight, window_strides=(1, 1), padding=((1, 1), (1, 1)),
        dimension_numbers=("NCHW", "OIHW", "NCHW"))
    ref = jnp.maximum(ref + bias.reshape(1, C_out, 1, 1), 0.0)

    # f32 operands: tight numerical check.
    y32 = basic_conv2d(x, weight, bias, stride=1, padding=1,
                       compute_dtype=jnp.float32)
    y32 = jax.block_until_ready(y32)
    assert y32.shape == (N, C_out, H, W)
    assert jnp.allclose(y32, ref, atol=1e-4, rtol=1e-4)

    # bf16 operands (fast production path, f32 accumulation): looser check.
    y16 = basic_conv2d(x, weight, bias, stride=1, padding=1,
                       compute_dtype=jnp.bfloat16)
    y16 = jax.block_until_ready(y16)
    assert y16.shape == (N, C_out, H, W)
    assert jnp.allclose(y16, ref, atol=2e-2, rtol=2e-2)

    print("KERNEL_OK")
</pallas_src>

<mosaic_0001>
module attributes {stable_mosaic.version = 11 : i64} {
  func.func @_conv_relu_kernel(%arg0: i32, %arg1: i32, %arg2: memref<256x128xf32, #tpu.memory_space<vmem>>, %arg3: memref<128x128xf32, #tpu.memory_space<vmem>>, %arg4: memref<1x128xf32, #tpu.memory_space<vmem>>, %arg5: memref<256x128xf32, #tpu.memory_space<vmem>>, %arg6: memref<256x128xf32, #tpu.memory_space<vmem>>) attributes {dimension_semantics = [#tpu.dimension_semantics<parallel>, #tpu.dimension_semantics<arbitrary>], iteration_bounds = array<i64: 2, 1>, scalar_prefetch = 0 : i64, scratch_operands = 1 : i64, tpu.core_type = #tpu.core_type<tc>, window_params = [{transform_indices = @transform_0, window_bounds = array<i64: 256, 128>}, {transform_indices = @transform_1, window_bounds = array<i64: 128, 128>}, {pipeline_mode = #tpu.pipeline_mode<synchronous>, transform_indices = @transform_2, window_bounds = array<i64: 1, 128>}, {transform_indices = @transform_3, window_bounds = array<i64: 256, 128>}]} {
    %c0_i32 = arith.constant 0 : i32
    %0 = arith.cmpi eq, %arg1, %c0_i32 : i32
    %1 = arith.extui %0 : i1 to i32
    %c0_i32_0 = arith.constant 0 : i32
    %2 = arith.cmpi ne, %1, %c0_i32_0 : i32
    scf.if %2 {
      %cst_10 = arith.constant 0.000000e+00 : f32
      %12 = vector.broadcast %cst_10 : f32 to vector<256x128xf32>
      %c0_11 = arith.constant 0 : index
      %c0_12 = arith.constant 0 : index
      %13 = vector.load %arg6[%c0_11, %c0_12] : memref<256x128xf32, #tpu.memory_space<vmem>>, vector<256x128xf32>
      tpu.vector_store %arg6[%c0_11, %c0_12], %12 {strides = array<i32>} : memref<256x128xf32, #tpu.memory_space<vmem>>, vector<256x128xf32>,
    } else {
    }
    %c0 = arith.constant 0 : index
    %c0_1 = arith.constant 0 : index
    %3 = vector.load %arg6[%c0, %c0_1] : memref<256x128xf32, #tpu.memory_space<vmem>>, vector<256x128xf32>
    %c0_2 = arith.constant 0 : index
    %c0_3 = arith.constant 0 : index
    %4 = vector.load %arg2[%c0_2, %c0_3] : memref<256x128xf32, #tpu.memory_space<vmem>>, vector<256x128xf32>
    %c0_4 = arith.constant 0 : index
    %c0_5 = arith.constant 0 : index
    %5 = vector.load %arg3[%c0_4, %c0_5] : memref<128x128xf32, #tpu.memory_space<vmem>>, vector<128x128xf32>
    %cst = arith.constant dense<0.000000e+00> : vector<256x128xf32>
    %6 = tpu.matmul %4, %5, %cst {dimension_numbers = #tpu.dot_dimension_numbers<[1], [0], [0], [1], [0, 0, 1, 1], [], []>} : vector<256x128xf32>, vector<128x128xf32>, vector<256x128xf32> -> vector<256x128xf32>
    %7 = arith.addf %3, %6 : vector<256x128xf32>
    %c0_6 = arith.constant 0 : index
    %c0_7 = arith.constant 0 : index
    %8 = vector.load %arg6[%c0_6, %c0_7] : memref<256x128xf32, #tpu.memory_space<vmem>>, vector<256x128xf32>
    tpu.vector_store %arg6[%c0_6, %c0_7], %7 {strides = array<i32>} : memref<256x128xf32, #tpu.memory_space<vmem>>, vector<256x128xf32>,
    %c0_i32_8 = arith.constant 0 : i32
    %9 = arith.cmpi eq, %arg1, %c0_i32_8 : i32
    %10 = arith.extui %9 : i1 to i32
    %c0_i32_9 = arith.constant 0 : i32
    %11 = arith.cmpi ne, %10, %c0_i32_9 : i32
    scf.if %11 {
      %c0_10 = arith.constant 0 : index
      %c0_11 = arith.constant 0 : index
      %12 = vector.load %arg6[%c0_10, %c0_11] : memref<256x128xf32, #tpu.memory_space<vmem>>, vector<256x128xf32>
      %c0_12 = arith.constant 0 : index
      %c0_13 = arith.constant 0 : index
      %13 = vector.load %arg4[%c0_12, %c0_13] : memref<1x128xf32, #tpu.memory_space<vmem>>, vector<1x128xf32>
      %14 = vector.broadcast %13 : vector<1x128xf32> to vector<256x128xf32>
      %15 = arith.addf %12, %14 : vector<256x128xf32>
      %cst_14 = arith.constant 0.000000e+00 : f32
      %16 = vector.broadcast %cst_14 : f32 to vector<256x128xf32>
      %17 = arith.maximumf %15, %16 : vector<256x128xf32>
      %c0_15 = arith.constant 0 : index
      %c0_16 = arith.constant 0 : index
      %18 = vector.load %arg5[%c0_15, %c0_16] : memref<256x128xf32, #tpu.memory_space<vmem>>, vector<256x128xf32>
      tpu.vector_store %arg5[%c0_15, %c0_16], %17 {strides = array<i32>} : memref<256x128xf32, #tpu.memory_space<vmem>>, vector<256x128xf32>,
    } else {
    }
    return
  }
  func.func @transform_0(%arg0: i32, %arg1: i32) -> (i32, i32) {
    %c0_i32 = arith.constant 0 : i32
    return %arg0, %arg1 : i32, i32
  }
  func.func @transform_1(%arg0: i32, %arg1: i32) -> (i32, i32) {
    %c0_i32 = arith.constant 0 : i32
    %c0_i32_0 = arith.constant 0 : i32
    return %arg1, %c0_i32 : i32, i32
  }
  func.func @transform_2(%arg0: i32, %arg1: i32) -> (i32, i32) {
    %c0_i32 = arith.constant 0 : i32
    %c0_i32_0 = arith.constant 0 : i32
    %c0_i32_1 = arith.constant 0 : i32
    return %c0_i32, %c0_i32_0 : i32, i32
  }
  func.func @transform_3(%arg0: i32, %arg1: i32) -> (i32, i32) {
    %c0_i32 = arith.constant 0 : i32
    %c0_i32_0 = arith.constant 0 : i32
    return %arg0, %c0_i32 : i32, i32
  }
}

</mosaic_0001>

<bundles_post_ra>
// kernel: tpu_custom_call.1
= control target key start
LH: loop header
LB: loop body
LE: loop exit
PB: predicated region body
PF: predicated region fallthrough
CT: control target
= control target key end

     0   :  { %s1356_s0 = inlined_call_operand.hbm [shape: f32[512,128], index: 0, kind: input, shape index: {}]   ;;  %s1357_s1 = inlined_call_operand.hbm [shape: f32[128,128], index: 1, kind: input, shape index: {}]   ;;  %s1358_s2 = inlined_call_operand.vmem [shape: f32[1,128], index: 2, kind: input, shape index: {}]   ;;  %s1359_s3 = inlined_call_operand.hbm [shape: f32[512,128], index: 3, kind: output, shape index: {}]  }
   0x1   :  { %1361 = sst [smem:[#allocation12_spill]] %s1357_s1 }
   0x2   :  { %8 = vsyncpa [#allocation4], 0 }
   0x3   :  { %10 = vsyncpa [#allocation4 + $0x1], 0 }
   0x4   :  { %11 = vsyncpa [#allocation7], 0 }
   0x5   :  { %12 = vsyncpa [#allocation5], 0 }
   0x6   :  { %14 = vsyncpa [#allocation5 + $0x1], 0  ;;  %s1091_s12 = smov 0   ;;  %s1093_s13 = smov 0  }
   0x7   :  { %s1095_s14 = smov 0   ;;  %s1097_s15 = smov 0  }
   0x8   :  { %s1099_s16 = smov 0   ;;  %s1101_s17 = smov 0  }
   0x9 LB: > { %s773_s18 = sadd.s32 4294967295, %s1064_s17   ;;  %s774_s19 = sadd.s32 4294967294, %s1064_s17   ;;  %s1064_s17 = sphi %s1101_s17, %s20_s17   ;;  %s1060_s16 = sphi %s1099_s16, %s1375_s16   ;;  %s1056_s15 = sphi %s1097_s15, %s1374_s15   ;;  %s1052_s14 = sphi %s1095_s14, %s1373_s14   ;;  %s1048_s13 = sphi %s1093_s13, %s1372_s13   ;;  %s1044_s12 = sphi %s1091_s12, %s1371_s12  }
   0xa   : > { %p54_p0 = scmp.ne.s32.totalorder %s1048_s13, %s1044_s12  ;;  %p1125_p1 = scmp.eq.s32.totalorder %s773_s18, 0 }
   0xb   : > { %p1129_p2 = scmp.eq.s32.totalorder %s773_s18, 1  ;;  %p131_p3 = scmp.eq.s32.totalorder %s774_s19, 1 }
   0xc   : > { %p1135_p4 = por %p1125_p1, %p54_p0  ;;  %p775_p5 = scmp.ge.s32.totalorder %s1064_s17, 1 }
   0xd   : > { %p1140_p6 = por %p131_p3, %p54_p0  ;;  %p138_p7 = scmp.lt.s32.totalorder %s1064_s17, 3 }
   0xe   : > { %s1366_s1 = sld [smem:[#allocation12_spill]]  ;;  %s1066_s28 = smov [#allocation6]  }
   0xf   : > { %p1148_p8 = pnand %p775_p5, %p138_p7  ;;  %s154_s29 = sshll.u32 %s1066_s28, 4  ;;  %s155_s29 = int_to_ptr.vmem [resolvable:$true] %s154_s29 }
  0x10   : > { %p777_p11 = scmp.ge.s32.totalorder %s1064_s17, 2  ;;  %s1360_s30 = smov 128  }
  0x11   : > { %p848_p9 = pneg %p1148_p8  ;;  %s1068_s4 = smov 8  }
  0x12   : > { %s32_s5 = sadd.s32 1, %s1060_s16  ;;  %s41_s6 = sadd.s32 1, %s1052_s14 }
  0x13   : > { %p849_p10 = pnand %p848_p9, %p1125_p1  ;;  %p34_p12 = scmp.ge.s32.totalorder %s32_s5, 2 }
  0x14   : > { %s152_s26 = sshll.u32 %s1366_s1, 4  ;;  %p48_p13 = scmp.ne.s32.totalorder %s1052_s14, %s1048_s13  ;;  %s153_s26 = int_to_ptr.hbm [resolvable:$true] %s152_s26 }
  0x15   : > { %851 = dma.hbm_to_vmem [thread:$0]  (!%p849_p10), %s153_s26, 2048, %s155_s29, [#allocation7], %s1360_s30, %s1360_s30, %s1068_s4  }
  0x16   : > { %p49_p0 = scmp.eq.s32.totalorder %s1064_s17, 0  ;;  %s1377_s5 = smov (%p34_p12, %s32_s5), 0 }
  0x17   : > { %p1173_p5 = por %p1129_p2, %p48_p13  ;;  %s36_s9 = ssub.s32 %s1060_s16, %s1377_s5 }
  0x18   : > { %p1167_p3 = por %p49_p0, %p48_p13  ;;  %p861_p7 = scmp.lt.s32.totalorder %s1064_s17, 2 }
  0x19   : > { %p39_p9 = scmp.eq.s32.totalorder %s36_s9, 0  ;;  %s171_s10 = sand.u32 1, %s1052_s14  }
  0x1a   : > { %s778_s11 = sshll.u32 %s171_s10, 8  ;;  %s790_s19 = sshll.u32 %s1060_s16, 8 }
  0x1b   : > { %s1182_s18 = scalar_select %p39_p9, %s1052_s14, %s41_s6  }
  0x1c   : > { %s181_s26 = scalar_lea.hbm %s1356_s0, %s790_s19  ;;  %s175_s28 = scalar_lea.vmem [#allocation3], %s778_s11 }
  0x1d   : > { %s184_s29 = sshll.u32 %s175_s28, 4  ;;  %s182_s21 = sshll.u32 %s181_s26, 4  ;;  %s185_s29 = int_to_ptr.vmem [resolvable:$true] %s184_s29  ;;  %s183_s21 = int_to_ptr.hbm [resolvable:$true] %s182_s21 }
  0x1e   : > { %p853_p2 = pnand %p861_p7, %p1167_p3  ;;  %s172_s30 = scalar_lea.sflag [#allocation4], %s171_s10 }
  0x1f   : > { %s1370_s1 = smov 128   ;;  %196 = sbr.rel (%p1148_p8) target bundleno = 268 (0x10c), region = 32 }
  0x20   : > { %855 = dma.hbm_to_vmem [thread:$0]  (!%p853_p2), %s183_s21, 4096, %s185_s29, %s172_s30, %s1370_s1, %s1370_s1, %s1068_s4  }
  0x21   : > { %s1196_s6 = sand.u32 (!%p1148_p8), 1, %s1048_s13  }
  0x22   : > { %s782_s9 = sshll.u32 (!%p1148_p8), %s1196_s6, 8  ;;  %s199_s11 = scalar_lea.sflag (!%p1148_p8), [#allocation4], %s1196_s6 }
  0x23   : > { %s1202_s7 = scalar_lea.vmem (!%p1148_p8), [#allocation3], %s782_s9 }
  0x24   : > { %1031 = dma.done.wait (%p1135_p4), %s199_s11, 4096  }
  0x25   : > { %1033 = vsyncadd (%p1135_p4), %s199_s11, 4294963200 }
  0x26   : > { %1035 = dma.done.wait (%p1125_p1), [#allocation7], 2048  }
  0x27   : > { %1037 = vsyncadd (%p1125_p1), [#allocation7], 4294965248  ;;  %v349_v0 = vld [vmem:[#allocation6 + $0x78] sm:$0xff]  ;;  %v348_v1 = vld [vmem:[#allocation6 + $0x70] sm:$0xff]  ;;  %s1253_s22 = scalar_lea.vmem [#allocation8], %s782_s9  ;;  %s791_s27 = sshll.u32 %s1056_s15, 8 }
  0x28   : > { %793 = vmatpush.msra.mxu2 %v349_v0  ;;  %794 = vmatpush.msra.mxu3 %v349_v0  ;;  %v347_v2 = vld [vmem:[#allocation6 + $0x68] sm:$0xff]  ;;  %v346_v3 = vld [vmem:[#allocation6 + $0x60] sm:$0xff]  ;;  %v345_v4 = vld [vmem:[#allocation6 + $0x58] sm:$0xff]  ;;  %s674_s10 = scalar_lea.hbm %s1359_s3, %s791_s27  ;;  %s675_s15 = sshll.u32 %s1253_s22, 4  ;;  %s676_s15 = int_to_ptr.vmem [resolvable:$true] %s675_s15 }
  0x29   : > { %350 = vmatpush.msra.mxu0 %v349_v0  ;;  %792 = vmatpush.msra.mxu1 %v349_v0  ;;  %v344_v5 = vld [vmem:[#allocation6 + $0x50] sm:$0xff]  ;;  %v343_v6 = vld [vmem:[#allocation6 + $0x48] sm:$0xff]  ;;  %v342_v7 = vld [vmem:[#allocation6 + $0x40] sm:$0xff]  ;;  %s677_s19 = sshll.u32 %s674_s10, 4  ;;  %s663_s24 = scalar_lea.sflag [#allocation5], %s1196_s6  ;;  %s678_s19 = int_to_ptr.hbm [resolvable:$true] %s677_s19 }
  0x2a   : > { %796 = vmatpush.msra.mxu2 %v348_v1  ;;  %797 = vmatpush.msra.mxu3 %v348_v1  ;;  %v341_v8 = vld [vmem:[#allocation6 + $0x38] sm:$0xff]  ;;  %v340_v9 = vld [vmem:[#allocation6 + $0x30] sm:$0xff]  ;;  %v339_v10 = vld [vmem:[#allocation6 + $0x28] sm:$0xff]  ;;  %s992_s25 = sshra.s32 %s678_s19, 4  ;;  %s998_s21 = scalar_lea.hbm %s1359_s3, 512  ;;  %s993_s25 = int_to_ptr.hbm [resolvable:$true] %s992_s25 }
  0x2b   : > { %351 = vmatpush.msra.mxu0 %v348_v1  ;;  %795 = vmatpush.msra.mxu1 %v348_v1  ;;  %v338_v11 = vld [vmem:[#allocation6 + $0x20] sm:$0xff]  ;;  %v337_v12 = vld [vmem:[#allocation6 + $0x18] sm:$0xff]  ;;  %v336_v13 = vld [vmem:[#allocation6 + $0x10] sm:$0xff]  ;;  %s994_s26 = scalar_lea.hbm %s993_s25, 256  ;;  %p999_p10 = scmp.lt.s32.totalorder %s993_s25, %s1359_s3 }
  0x2c   : > { %799 = vmatpush.msra.mxu2 %v347_v2  ;;  %800 = vmatpush.msra.mxu3 %v347_v2  ;;  %v335_v14 = vld [vmem:[#allocation6 + $0x8] sm:$0xff]  ;;  %v334_v15 = vld [vmem:[#allocation6] sm:$0xff]  ;;  %v320_v24 = vld [vmem:[%s1202_s7 + $0x90] sm:$0xff]  ;;  %p995_p1 = scmp.ne.s32.totalorder %s993_s25, %s994_s26  ;;  %p1000_p12 = scmp.lt.s32.totalorder %s998_s21, %s994_s26 }
  0x2d   : > { %352 = vmatpush.msra.mxu0 %v347_v2  ;;  %798 = vmatpush.msra.mxu1 %v347_v2  ;;  %v318_v16 = vld [vmem:[%s1202_s7 + $0x80] sm:$0xff]  ;;  %v319_v20 = vld [vmem:[%s1202_s7 + $0x88] sm:$0xff]  ;;  %v328_v25 = vld [vmem:[%s1202_s7 + $0xd0] sm:$0xff] }
  0x2e   : > { %802 = vmatpush.msra.mxu2 %v346_v3  ;;  %803 = vmatpush.msra.mxu3 %v346_v3  ;;  %v326_v17 = vld [vmem:[%s1202_s7 + $0xc0] sm:$0xff]  ;;  %v327_v21 = vld [vmem:[%s1202_s7 + $0xc8] sm:$0xff]  ;;  %v304_v26 = vld [vmem:[%s1202_s7 + $0x10] sm:$0xff]  ;;  %p996_p4 = pnand %p995_p1, %p1173_p5  ;;  %p1001_p13 = por %p1000_p12, %p999_p10 }
  0x2f   : > { %353 = vmatpush.msra.mxu0 %v346_v3  ;;  %801 = vmatpush.msra.mxu1 %v346_v3  ;;  %v302_v18 = vld [vmem:[%s1202_s7] sm:$0xff]  ;;  %v303_v22 = vld [vmem:[%s1202_s7 + $0x8] sm:$0xff]  ;;  %v312_v27 = vld [vmem:[%s1202_s7 + $0x50] sm:$0xff] }
  0x30   : > { %805 = vmatpush.msra.mxu2 %v345_v4  ;;  %806 = vmatpush.msra.mxu3 %v345_v4  ;;  %v310_v19 = vld [vmem:[%s1202_s7 + $0x40] sm:$0xff]  ;;  %v311_v23 = vld [vmem:[%s1202_s7 + $0x48] sm:$0xff]  ;;  %v321_v28 = vld [vmem:[%s1202_s7 + $0x98] sm:$0xff]  ;;  %p997_p8 = pneg %p996_p4 }
  0x31   : > { %354 = vmatpush.msra.mxu0 %v345_v4  ;;  %804 = vmatpush.msra.mxu1 %v345_v4  ;;  %v329_v29 = vld [vmem:[%s1202_s7 + $0xd8] sm:$0xff]  ;;  %v322_v32 = vld [vmem:[%s1202_s7 + $0xa0] sm:$0xff]  ;;  %v323_v36 = vld [vmem:[%s1202_s7 + $0xa8] sm:$0xff] }
  0x32   : > { %808 = vmatpush.msra.mxu2 %v344_v5  ;;  %809 = vmatpush.msra.mxu3 %v344_v5  ;;  %v305_v30 = vld [vmem:[%s1202_s7 + $0x18] sm:$0xff]  ;;  %v330_v33 = vld [vmem:[%s1202_s7 + $0xe0] sm:$0xff]  ;;  %v331_v37 = vld [vmem:[%s1202_s7 + $0xe8] sm:$0xff]  ;;  %p1002_p0 = pnand %p1001_p13, %p997_p8 }
  0x33   : > { %355 = vmatpush.msra.mxu0 %v344_v5  ;;  %807 = vmatpush.msra.mxu1 %v344_v5  ;;  %v313_v31 = vld [vmem:[%s1202_s7 + $0x58] sm:$0xff]  ;;  %v306_v34 = vld [vmem:[%s1202_s7 + $0x20] sm:$0xff]  ;;  %v307_v38 = vld [vmem:[%s1202_s7 + $0x28] sm:$0xff] }
  0x34   : > { %811 = vmatpush.msra.mxu2 %v343_v6  ;;  %812 = vmatpush.msra.mxu3 %v343_v6  ;;  %v314_v35 = vld [vmem:[%s1202_s7 + $0x60] sm:$0xff]  ;;  %v315_v39 = vld [vmem:[%s1202_s7 + $0x68] sm:$0xff]  ;;  %v324_v40 = vld [vmem:[%s1202_s7 + $0xb0] sm:$0xff] }
  0x35   : > { %356 = vmatpush.msra.mxu0 %v343_v6  ;;  %810 = vmatpush.msra.mxu1 %v343_v6  ;;  %v332_v41 = vld [vmem:[%s1202_s7 + $0xf0] sm:$0xff]  ;;  %v325_v44 = vld [vmem:[%s1202_s7 + $0xb8] sm:$0xff]  ;;  %v1247_v48 = vld [vmem:[%s1358_s2] ss:$0 sm:$0xff] }
  0x36   : > { %814 = vmatpush.msra.mxu2 %v342_v7  ;;  %815 = vmatpush.msra.mxu3 %v342_v7  ;;  %v308_v42 = vld [vmem:[%s1202_s7 + $0x30] sm:$0xff]  ;;  %v333_v45 = vld [vmem:[%s1202_s7 + $0xf8] sm:$0xff] }
  0x37   : > { %357 = vmatpush.msra.mxu0 %v342_v7  ;;  %813 = vmatpush.msra.mxu1 %v342_v7  ;;  %v316_v43 = vld [vmem:[%s1202_s7 + $0x70] sm:$0xff]  ;;  %v309_v46 = vld [vmem:[%s1202_s7 + $0x38] sm:$0xff] }
  0x38   : > { %817 = vmatpush.msra.mxu2 %v341_v8  ;;  %818 = vmatpush.msra.mxu3 %v341_v8  ;;  %v317_v47 = vld [vmem:[%s1202_s7 + $0x78] sm:$0xff] }
  0x39   : > { %358 = vmatpush.msra.mxu0 %v341_v8  ;;  %816 = vmatpush.msra.mxu1 %v341_v8 }
  0x3a   : > { %820 = vmatpush.msra.mxu2 %v340_v9  ;;  %821 = vmatpush.msra.mxu3 %v340_v9 }
  0x3b   : > { %359 = vmatpush.msra.mxu0 %v340_v9  ;;  %819 = vmatpush.msra.mxu1 %v340_v9 }
  0x3c   : > { %823 = vmatpush.msra.mxu2 %v339_v10  ;;  %824 = vmatpush.msra.mxu3 %v339_v10 }
  0x3d   : > { %360 = vmatpush.msra.mxu0 %v339_v10  ;;  %822 = vmatpush.msra.mxu1 %v339_v10 }
  0x3e   : > { %826 = vmatpush.msra.mxu2 %v338_v11  ;;  %827 = vmatpush.msra.mxu3 %v338_v11 }
  0x3f   : > { %361 = vmatpush.msra.mxu0 %v338_v11  ;;  %825 = vmatpush.msra.mxu1 %v338_v11 }
  0x40   : > { %829 = vmatpush.msra.mxu2 %v337_v12  ;;  %830 = vmatpush.msra.mxu3 %v337_v12 }
  0x41   : > { %362 = vmatpush.msra.mxu0 %v337_v12  ;;  %828 = vmatpush.msra.mxu1 %v337_v12 }
  0x42   : > { %832 = vmatpush.msra.mxu2 %v336_v13  ;;  %833 = vmatpush.msra.mxu3 %v336_v13 }
  0x43   : > { %363 = vmatpush.msra.mxu0 %v336_v13  ;;  %831 = vmatpush.msra.mxu1 %v336_v13 }
  0x44   : > { %835 = vmatpush.msra.mxu2 %v335_v14  ;;  %836 = vmatpush.msra.mxu3 %v335_v14 }
  0x45   : > { %364 = vmatpush.msra.mxu0 %v335_v14  ;;  %834 = vmatpush.msra.mxu1 %v335_v14 }
  0x46   : > { %838 = vmatpush.msra.mxu2 %v334_v15  ;;  %839 = vmatpush.msra.mxu3 %v334_v15 }
  0x47   : > { %414 = vmatmul.f32.vlgmr.msra.gmra.mxu2 %v318_v16  ;;  %438 = vmatmul.f32.vlgmr.msra.gmra.mxu3 %v326_v17 }
  0x48   : > { %365 = vmatpush.msra.mxu0 %v334_v15  ;;  %837 = vmatpush.msra.mxu1 %v334_v15 }
  0x49   : > { %366 = vmatmul.f32.vlgmr.msra.gmra.mxu0 %v302_v18  ;;  %390 = vmatmul.f32.vlgmr.msra.gmra.mxu1 %v310_v19 }
  0x4f   : > { %417 = vmatmul.f32.gmra.mxu2 %v319_v20  ;;  %441 = vmatmul.f32.gmra.mxu3 %v327_v21 }
  0x51   : > { %369 = vmatmul.f32.gmra.mxu0 %v303_v22  ;;  %393 = vmatmul.f32.gmra.mxu1 %v311_v23 }
  0x57   : > { %420 = vmatmul.f32.gmra.mxu2 %v320_v24  ;;  %444 = vmatmul.f32.gmra.mxu3 %v328_v25 }
  0x59   : > { %372 = vmatmul.f32.gmra.mxu0 %v304_v26  ;;  %396 = vmatmul.f32.gmra.mxu1 %v312_v27 }
  0x5f   : > { %423 = vmatmul.f32.gmra.mxu2 %v321_v28  ;;  %447 = vmatmul.f32.gmra.mxu3 %v329_v29 }
  0x61   : > { %375 = vmatmul.f32.gmra.mxu0 %v305_v30  ;;  %399 = vmatmul.f32.gmra.mxu1 %v313_v31 }
  0x67   : > { %426 = vmatmul.f32.gmra.mxu2 %v322_v32  ;;  %450 = vmatmul.f32.gmra.mxu3 %v330_v33 }
  0x69   : > { %378 = vmatmul.f32.gmra.mxu0 %v306_v34  ;;  %402 = vmatmul.f32.gmra.mxu1 %v314_v35 }
  0x6f   : > { %429 = vmatmul.f32.gmra.mxu2 %v323_v36  ;;  %453 = vmatmul.f32.gmra.mxu3 %v331_v37 }
  0x71   : > { %381 = vmatmul.f32.gmra.mxu0 %v307_v38  ;;  %405 = vmatmul.f32.gmra.mxu1 %v315_v39 }
  0x77   : > { %432 = vmatmul.f32.gmra.mxu2 %v324_v40  ;;  %456 = vmatmul.f32.gmra.mxu3 %v332_v41 }
  0x79   : > { %384 = vmatmul.f32.gmra.mxu0 %v308_v42  ;;  %408 = vmatmul.f32.gmra.mxu1 %v316_v43 }
  0x7f   : > { %435 = vmatmul.f32.gmra.mxu2 %v325_v44  ;;  %459 = vmatmul.f32.gmra.mxu3 %v333_v45 }
  0x81   : > { %387 = vmatmul.f32.gmra.mxu0 %v309_v46  ;;  %411 = vmatmul.f32.gmra.mxu1 %v317_v47 }
  0xc6   : > { %v367_v49 = vpop.f32.mrf.mxu0  ;;  %v391_v50 = vpop.f32.mrf.mxu1 }
  0xc7   : > { %v566_v51 = vadd.f32 %v1247_v48, %v367_v49  ;;  %v574_v52 = vadd.f32 %v1247_v48, %v391_v50 }
  0xc9   : > { %v598_v53 = vmax.f32 %v566_v51, 0.0  ;;  %v606_v54 = vmax.f32 %v574_v52, 0.0 }
  0xca   : > { %v415_v55 = vpop.f32.mrf.mxu2  ;;  %v439_v56 = vpop.f32.mrf.mxu3 }
  0xcb   : > { %630 = vst [vmem:[%s1253_s22] sm:$0xff] %v598_v53  ;;  %v582_v57 = vadd.f32 %v1247_v48, %v415_v55  ;;  %v590_v58 = vadd.f32 %v1247_v48, %v439_v56 }
  0xcc   : > { %638 = vst [vmem:[%s1253_s22 + $0x40] sm:$0xff] %v606_v54 }
  0xcd   : > { %v614_v59 = vmax.f32 %v582_v57, 0.0  ;;  %v622_v60 = vmax.f32 %v590_v58, 0.0 }
  0xce   : > { %v370_v61 = vpop.f32.mrf.mxu0  ;;  %v394_v62 = vpop.f32.mrf.mxu1 }
  0xcf   : > { %646 = vst [vmem:[%s1253_s22 + $0x80] sm:$0xff] %v614_v59  ;;  %v567_v63 = vadd.f32 %v1247_v48, %v370_v61  ;;  %v575_v0 = vadd.f32 %v1247_v48, %v394_v62 }
  0xd0   : > { %654 = vst [vmem:[%s1253_s22 + $0xc0] sm:$0xff] %v622_v60 }
  0xd1   : > { %v599_v1 = vmax.f32 %v567_v63, 0.0  ;;  %v607_v2 = vmax.f32 %v575_v0, 0.0 }
  0xd2   : > { %v418_v3 = vpop.f32.mrf.mxu2  ;;  %v442_v4 = vpop.f32.mrf.mxu3 }
  0xd3   : > { %631 = vst [vmem:[%s1253_s22 + $0x8] sm:$0xff] %v599_v1  ;;  %v583_v5 = vadd.f32 %v1247_v48, %v418_v3  ;;  %v591_v6 = vadd.f32 %v1247_v48, %v442_v4 }
  0xd4   : > { %639 = vst [vmem:[%s1253_s22 + $0x48] sm:$0xff] %v607_v2 }
  0xd5   : > { %v615_v7 = vmax.f32 %v583_v5, 0.0  ;;  %v623_v8 = vmax.f32 %v591_v6, 0.0 }
  0xd6   : > { %v373_v9 = vpop.f32.mrf.mxu0  ;;  %v397_v10 = vpop.f32.mrf.mxu1 }
  0xd7   : > { %647 = vst [vmem:[%s1253_s22 + $0x88] sm:$0xff] %v615_v7  ;;  %v568_v11 = vadd.f32 %v1247_v48, %v373_v9  ;;  %v576_v12 = vadd.f32 %v1247_v48, %v397_v10 }
  0xd8   : > { %655 = vst [vmem:[%s1253_s22 + $0xc8] sm:$0xff] %v623_v8 }
  0xd9   : > { %v600_v13 = vmax.f32 %v568_v11, 0.0  ;;  %v608_v14 = vmax.f32 %v576_v12, 0.0 }
  0xda   : > { %v421_v15 = vpop.f32.mrf.mxu2  ;;  %v445_v16 = vpop.f32.mrf.mxu3 }
  0xdb   : > { %632 = vst [vmem:[%s1253_s22 + $0x10] sm:$0xff] %v600_v13  ;;  %v584_v17 = vadd.f32 %v1247_v48, %v421_v15  ;;  %v592_v18 = vadd.f32 %v1247_v48, %v445_v16 }
  0xdc   : > { %640 = vst [vmem:[%s1253_s22 + $0x50] sm:$0xff] %v608_v14 }
  0xdd   : > { %v616_v19 = vmax.f32 %v584_v17, 0.0  ;;  %v624_v20 = vmax.f32 %v592_v18, 0.0 }
  0xde   : > { %v376_v21 = vpop.f32.mrf.mxu0  ;;  %v400_v22 = vpop.f32.mrf.mxu1 }
  0xdf   : > { %648 = vst [vmem:[%s1253_s22 + $0x90] sm:$0xff] %v616_v19  ;;  %v569_v23 = vadd.f32 %v1247_v48, %v376_v21  ;;  %v577_v24 = vadd.f32 %v1247_v48, %v400_v22 }
  0xe0   : > { %656 = vst [vmem:[%s1253_s22 + $0xd0] sm:$0xff] %v624_v20 }
  0xe1   : > { %v601_v25 = vmax.f32 %v569_v23, 0.0  ;;  %v609_v26 = vmax.f32 %v577_v24, 0.0 }
  0xe2   : > { %v424_v27 = vpop.f32.mrf.mxu2  ;;  %v448_v28 = vpop.f32.mrf.mxu3 }
  0xe3   : > { %633 = vst [vmem:[%s1253_s22 + $0x18] sm:$0xff] %v601_v25  ;;  %v585_v29 = vadd.f32 %v1247_v48, %v424_v27  ;;  %v593_v30 = vadd.f32 %v1247_v48, %v448_v28 }
  0xe4   : > { %641 = vst [vmem:[%s1253_s22 + $0x58] sm:$0xff] %v609_v26 }
  0xe5   : > { %v617_v31 = vmax.f32 %v585_v29, 0.0  ;;  %v625_v32 = vmax.f32 %v593_v30, 0.0 }
  0xe6   : > { %v379_v33 = vpop.f32.mrf.mxu0  ;;  %v403_v34 = vpop.f32.mrf.mxu1 }
  0xe7   : > { %649 = vst [vmem:[%s1253_s22 + $0x98] sm:$0xff] %v617_v31  ;;  %v570_v35 = vadd.f32 %v1247_v48, %v379_v33  ;;  %v578_v36 = vadd.f32 %v1247_v48, %v403_v34 }
  0xe8   : > { %657 = vst [vmem:[%s1253_s22 + $0xd8] sm:$0xff] %v625_v32 }
  0xe9   : > { %v602_v37 = vmax.f32 %v570_v35, 0.0  ;;  %v610_v38 = vmax.f32 %v578_v36, 0.0 }
  0xea   : > { %v427_v39 = vpop.f32.mrf.mxu2  ;;  %v451_v40 = vpop.f32.mrf.mxu3 }
  0xeb   : > { %634 = vst [vmem:[%s1253_s22 + $0x20] sm:$0xff] %v602_v37  ;;  %v586_v41 = vadd.f32 %v1247_v48, %v427_v39  ;;  %v594_v42 = vadd.f32 %v1247_v48, %v451_v40 }
  0xec   : > { %642 = vst [vmem:[%s1253_s22 + $0x60] sm:$0xff] %v610_v38 }
  0xed   : > { %v618_v43 = vmax.f32 %v586_v41, 0.0  ;;  %v626_v44 = vmax.f32 %v594_v42, 0.0 }
  0xee   : > { %v382_v45 = vpop.f32.mrf.mxu0  ;;  %v406_v46 = vpop.f32.mrf.mxu1 }
  0xef   : > { %650 = vst [vmem:[%s1253_s22 + $0xa0] sm:$0xff] %v618_v43  ;;  %v571_v47 = vadd.f32 %v1247_v48, %v382_v45  ;;  %v579_v49 = vadd.f32 %v1247_v48, %v406_v46 }
  0xf0   : > { %658 = vst [vmem:[%s1253_s22 + $0xe0] sm:$0xff] %v626_v44 }
  0xf1   : > { %v603_v50 = vmax.f32 %v571_v47, 0.0  ;;  %v611_v51 = vmax.f32 %v579_v49, 0.0 }
  0xf2   : > { %v430_v52 = vpop.f32.mrf.mxu2  ;;  %v454_v53 = vpop.f32.mrf.mxu3 }
  0xf3   : > { %635 = vst [vmem:[%s1253_s22 + $0x28] sm:$0xff] %v603_v50  ;;  %v587_v54 = vadd.f32 %v1247_v48, %v430_v52  ;;  %v595_v55 = vadd.f32 %v1247_v48, %v454_v53 }
  0xf4   : > { %643 = vst [vmem:[%s1253_s22 + $0x68] sm:$0xff] %v611_v51 }
  0xf5   : > { %v619_v56 = vmax.f32 %v587_v54, 0.0  ;;  %v627_v57 = vmax.f32 %v595_v55, 0.0 }
  0xf6   : > { %v385_v58 = vpop.f32.mrf.mxu0  ;;  %v409_v59 = vpop.f32.mrf.mxu1 }
  0xf7   : > { %651 = vst [vmem:[%s1253_s22 + $0xa8] sm:$0xff] %v619_v56  ;;  %v572_v60 = vadd.f32 %v1247_v48, %v385_v58  ;;  %v580_v61 = vadd.f32 %v1247_v48, %v409_v59 }
  0xf8   : > { %659 = vst [vmem:[%s1253_s22 + $0xe8] sm:$0xff] %v627_v57 }
  0xf9   : > { %v604_v62 = vmax.f32 %v572_v60, 0.0  ;;  %v612_v63 = vmax.f32 %v580_v61, 0.0 }
  0xfa   : > { %v433_v0 = vpop.f32.mrf.mxu2  ;;  %v457_v1 = vpop.f32.mrf.mxu3 }
  0xfb   : > { %636 = vst [vmem:[%s1253_s22 + $0x30] sm:$0xff] %v604_v62  ;;  %v588_v2 = vadd.f32 %v1247_v48, %v433_v0  ;;  %v596_v3 = vadd.f32 %v1247_v48, %v457_v1 }
  0xfc   : > { %644 = vst [vmem:[%s1253_s22 + $0x70] sm:$0xff] %v612_v63 }
  0xfd   : > { %v620_v4 = vmax.f32 %v588_v2, 0.0  ;;  %v628_v5 = vmax.f32 %v596_v3, 0.0 }
  0xfe   : > { %v388_v6 = vpop.f32.mrf.mxu0  ;;  %v412_v7 = vpop.f32.mrf.mxu1 }
  0xff   : > { %652 = vst [vmem:[%s1253_s22 + $0xb0] sm:$0xff] %v620_v4  ;;  %v573_v8 = vadd.f32 %v1247_v48, %v388_v6  ;;  %v581_v9 = vadd.f32 %v1247_v48, %v412_v7 }
 0x100   : > { %660 = vst [vmem:[%s1253_s22 + $0xf0] sm:$0xff] %v628_v5 }
 0x101   : > { %v605_v10 = vmax.f32 %v573_v8, 0.0  ;;  %v613_v11 = vmax.f32 %v581_v9, 0.0 }
 0x102   : > { %v436_v12 = vpop.f32.mrf.mxu2  ;;  %v460_v13 = vpop.f32.mrf.mxu3 }
 0x103   : > { %637 = vst [vmem:[%s1253_s22 + $0x38] sm:$0xff] %v605_v10  ;;  %v589_v14 = vadd.f32 %v1247_v48, %v436_v12  ;;  %v597_v15 = vadd.f32 %v1247_v48, %v460_v13 }
 0x104   : > { %645 = vst [vmem:[%s1253_s22 + $0x78] sm:$0xff] %v613_v11 }
 0x105   : > { %v621_v16 = vmax.f32 %v589_v14, 0.0  ;;  %v629_v17 = vmax.f32 %v597_v15, 0.0 }
 0x107   : > { %653 = vst [vmem:[%s1253_s22 + $0xb8] sm:$0xff] %v621_v16 }
 0x108   : > { %661 = vst [vmem:[%s1253_s22 + $0xf8] sm:$0xff] %v629_v17 }
 0x109   : > { %1005 = shalt.err (!%p1002_p0)
}
 0x10a   : > { %s1069_s6 = smov 128   ;;  %s1070_s7 = smov 8  }
 0x10b   : > { %846 = dma.vmem_to_hbm [thread:$0]  (%p1173_p5), %s676_s15, 4096, %s678_s19, %s663_s24, %s1069_s6, %s1069_s6, %s1070_s7  }
 0x10c PF: > { %s692_s1 = sand.u32 1, %s1044_s12   ;;  %p857_p3 = pnand %p777_p11, %p1140_p6 }
 0x10d   : > { %s693_s20 = scalar_lea.sflag [#allocation5], %s692_s1 }
 0x10e   : > { %p858_p7 = pneg %p857_p3 }
 0x110   : > { %1039 = dma.done.wait (%p858_p7), %s693_s20, 4096  }
 0x111   : > { %1041 = vsyncadd (%p858_p7), %s693_s20, 4294963200  ;;  %s20_s17 = sadd.s32 1, %s1064_s17   ;;  %s1371_s12 = smov %s1048_s13 }
 0x112   : > { %p17_p9 = scmp.ge.s32.totalorder %s20_s17, 4   ;;  %s1372_s13 = smov %s1052_s14 }
 0x113   : > { %s1373_s14 = smov %s1182_s18  ;;  %s1374_s15 = smov %s1060_s16 }
 0x114   : > { %s1375_s16 = smov %s1377_s5  ;;  %19 = sbr.rel (!%p17_p9) target bundleno = 9 (0x9), region = 90 }
 0x119   :  { %699 = vsyncpa [#allocation4], 1 }
 0x11a   :  { %701 = vsyncpa [#allocation4 + $0x1], 1 }
 0x11b   :  { %702 = vsyncpa [#allocation7], 1 }
 0x11c   :  { %703 = vsyncpa [#allocation5], 1 }
 0x11d   :  { %705 = vsyncpa [#allocation5 + $0x1], 1 }

</bundles_post_ra>
